<compile_context>
chip_gen: v5e
topology: v5e:2x2
jax: 0.10.0
libtpu: 0.0.40
codegen_flags: <defaults>
</compile_context>

<pallas_src>
import jax
import jax.numpy as jnp
from jax import lax
from jax.experimental import pallas as pl
from jax.experimental.pallas import tpu as pltpu

_IN_EPS = 1e-3   # InstanceNorm2d eps
_BN_EPS = 1e-5   # BatchNorm2d eps


def _in_stats_kernel(x_ref, mu_ref, var_ref):
    """Grid over B ("parallel"): per-(b,c) instance-norm mean and biased variance
    over the spatial (lane) axis.  Each grid step writes its own (C, 1) blocks,
    so there is no cross-step accumulation and the batch axis can shard across
    both v7x TensorCores."""
    x = x_ref[...]                                             # (C, N)
    mu = jnp.mean(x, axis=1, keepdims=True)                    # (C, 1)
    # Centered two-pass variance (numerically safe even when |mu| >> sigma).
    var = jnp.mean(jnp.square(x - mu), axis=1, keepdims=True)  # (C, 1)
    mu_ref[...] = mu
    var_ref[...] = var


def _diff_pool_main_kernel(x_ref, w_ref, a_ref, b_ref, out_ref):
    """Grid over B ("parallel"): fused (IN + BN) affine + ReLU -> 1x1 conv ->
    softmax over N -> pooling matmul.  One (C, N) batch tile per grid step;
    conv weight and the per-(b,c) affine stay resident across the grid."""
    x = x_ref[...]                                             # (C, N)

    # InstanceNorm + BatchNorm + ReLU collapsed into a single FMA + max pass
    # (per-(b,c) scale/shift precomputed from stage-1 stats in the wrapper).
    h = jnp.maximum(x * a_ref[...] + b_ref[...], 0.0)          # (C, N)

    # 1x1 conv as a canonical (P,C)x(C,N) MXU matmul.  The conv bias is constant
    # along N, hence cancelled by the softmax -> omitted entirely.
    emb = jnp.dot(w_ref[...], h, preferred_element_type=jnp.float32)   # (P, N)

    # Softmax over the spatial (lane) axis N; EUP reciprocal replaces the divide.
    m = jnp.max(emb, axis=1, keepdims=True)                    # (P, 1)
    e = jnp.exp(emb - m)                                       # (P, N)
    s = e * pl.reciprocal(jnp.sum(e, axis=1, keepdims=True), approx=True)

    # Pooling out = x @ s^T as a transposed-RHS contraction: Mosaic consumes s
    # in its native (P, N) layout, no explicit (N, P) transpose temporary.
    # TODO(synk): pad P to 128 (lane-dense slab) only if xprof shows store stalls.
    out_ref[...] = lax.dot_general(
        x, s,
        dimension_numbers=(((1,), (1,)), ((), ())),
        preferred_element_type=jnp.float32)                    # (C, P)


@jax.jit
def diff_pool_forward(x_nchw, conv_w, conv_b, bn_gamma, bn_beta):
    """x_nchw: (B, C, N, 1) f32. Returns (B, C, P, 1) f32."""
    B, C, N, W = x_nchw.shape
    assert W == 1, "diff_pool expects trailing spatial dim of size 1"
    P = conv_w.shape[0]
    del conv_b  # per-row constant along N: exactly cancelled by the softmax

    x3 = x_nchw.reshape(B, C, N).astype(jnp.float32)
    w2 = conv_w.reshape(P, C).astype(jnp.float32)
    gamma = bn_gamma.reshape(C).astype(jnp.float32)
    beta = bn_beta.reshape(C).astype(jnp.float32)

    # ---- Stage 1: per-(b,c) instance-norm statistics only (batch-parallel). ----
    mu_b, var_b = pl.pallas_call(
        _in_stats_kernel,
        out_shape=(jax.ShapeDtypeStruct((B, C, 1), jnp.float32),
                   jax.ShapeDtypeStruct((B, C, 1), jnp.float32)),
        grid=(B,),
        in_specs=[pl.BlockSpec((None, C, N), lambda b: (b, 0, 0))],
        out_specs=(pl.BlockSpec((None, C, 1), lambda b: (b, 0, 0)),
                   pl.BlockSpec((None, C, 1), lambda b: (b, 0, 0))),
        compiler_params=pltpu.CompilerParams(
            dimension_semantics=("parallel",),
            vmem_limit_bytes=64 * 1024 * 1024),
    )(x3)

    # ---- Tiny (B,C)-sized XLA glue: fold InstanceNorm + training-mode BatchNorm
    # into one per-(b,c) affine.  Because xin is exactly instance-normalized,
    #   BN mean  == 0
    #   BN var   == E[xin^2] == mean_b( var / (var + 1e-3) )     (per channel)
    mu_bc = mu_b[:, :, 0]                                   # (B, C)
    var_bc = var_b[:, :, 0]                                 # (B, C)
    inv_sigma = lax.rsqrt(var_bc + _IN_EPS)                 # (B, C)
    var_bn = jnp.mean(var_bc / (var_bc + _IN_EPS), axis=0)  # (C,)
    scale_c = gamma * lax.rsqrt(var_bn + _BN_EPS)           # (C,)
    shift_c = beta                                          # BN mean == 0
    a_bc = inv_sigma * scale_c[None, :]                     # (B, C)
    b_bc = shift_c[None, :] - mu_bc * a_bc                  # (B, C)
    a3 = a_bc.reshape(B, C, 1)
    b3 = b_bc.reshape(B, C, 1)

    # ---- Stage 2: batch-parallel main kernel (one (C, N) tile per grid step). ----
    # TODO(synk): for v7x production shapes, tile N with an online softmax instead
    # of one monolithic (C, N) tile (64 MiB VMEM), and/or fuse both stages into a
    # single call when B*C*N*4B fits in VMEM to avoid reading x from HBM twice.
    out3 = pl.pallas_call(
        _diff_pool_main_kernel,
        out_shape=jax.ShapeDtypeStruct((B, C, P), jnp.float32),
        grid=(B,),
        in_specs=[
            pl.BlockSpec((None, C, N), lambda b: (b, 0, 0)),   # x tile
            pl.BlockSpec((P, C), lambda b: (0, 0)),            # 1x1 conv weight
            pl.BlockSpec((None, C, 1), lambda b: (b, 0, 0)),   # fused affine scale
            pl.BlockSpec((None, C, 1), lambda b: (b, 0, 0)),   # fused affine shift
        ],
        out_specs=pl.BlockSpec((None, C, P), lambda b: (b, 0, 0)),
        compiler_params=pltpu.CompilerParams(
            dimension_semantics=("parallel",),
            vmem_limit_bytes=64 * 1024 * 1024),
    )(x3, w2, a3, b3)

    return out3.reshape(B, C, P, 1)


def _reference_forward(x_nchw, conv_w, conv_b, bn_gamma, bn_beta):
    """Pure-JAX reference mirroring the PyTorch forward (training-mode BN)."""
    B, C, N, _ = x_nchw.shape
    P = conv_w.shape[0]
    x = x_nchw.reshape(B, C, N).astype(jnp.float32)
    w = conv_w.reshape(P, C).astype(jnp.float32)
    # InstanceNorm2d(eps=1e-3)
    mu = jnp.mean(x, axis=2, keepdims=True)
    var = jnp.mean(jnp.square(x - mu), axis=2, keepdims=True)
    xin = (x - mu) / jnp.sqrt(var + 1e-3)
    # BatchNorm2d training-mode batch stats (eps=1e-5)
    mu_c = jnp.mean(xin, axis=(0, 2), keepdims=True)
    var_c = jnp.mean(jnp.square(xin - mu_c), axis=(0, 2), keepdims=True)
    xbn = (xin - mu_c) / jnp.sqrt(var_c + 1e-5) * bn_gamma[None, :, None] \
          + bn_beta[None, :, None]
    h = jnp.maximum(xbn, 0.0)
    # 1x1 conv
    emb = jnp.einsum('pc,bcn->bpn', w, h) + conv_b[None, :, None]
    # softmax over spatial axis
    s = jax.nn.softmax(emb, axis=2)
    out = jnp.einsum('bcn,bpn->bcp', x, s)
    return out.reshape(B, C, -1, 1)


if __name__ == "__main__":
    B, C, N = 2, 4, 16      # batch, in_channel, spatial points (H); W = 1
    P = 8                   # output_points

    key = jax.random.PRNGKey(0)
    kx, kw, kb = jax.random.split(key, 3)

    x = jax.random.normal(kx, (B, C, N, 1), dtype=jnp.float32)
    # Deterministic synthetic parameters (shapes from the module __init__)
    conv_w = jax.random.normal(kw, (P, C, 1, 1), dtype=jnp.float32) * 0.1  # Conv2d 1x1
    conv_b = jax.random.normal(kb, (P,), dtype=jnp.float32) * 0.1          # Conv2d bias
    bn_gamma = jnp.ones((C,), dtype=jnp.float32)                           # BN weight
    bn_beta = jnp.zeros((C,), dtype=jnp.float32)                           # BN bias

    out = diff_pool_forward(x, conv_w, conv_b, bn_gamma, bn_beta)
    out = jax.block_until_ready(out)

    ref = _reference_forward(x, conv_w, conv_b, bn_gamma, bn_beta)
    assert out.shape == (B, C, P, 1), out.shape
    assert jnp.allclose(out, ref, atol=1e-3, rtol=1e-3), \
        f"mismatch vs JAX reference, max abs err {jnp.max(jnp.abs(out - ref))}"

    print("KERNEL_OK")
</pallas_src>

<mosaic_0001>
module attributes {stable_mosaic.version = 11 : i64} {
  func.func @_in_stats_kernel(%arg0: i32, %arg1: memref<1x4x16xf32, #tpu.memory_space<vmem>>, %arg2: memref<1x4x1xf32, #tpu.memory_space<vmem>>, %arg3: memref<1x4x1xf32, #tpu.memory_space<vmem>>) attributes {dimension_semantics = [#tpu.dimension_semantics<parallel>], iteration_bounds = array<i64: 2>, scalar_prefetch = 0 : i64, scratch_operands = 0 : i64, tpu.core_type = #tpu.core_type<tc>, window_params = [{transform_indices = @transform_0, window_bounds = array<i64: 1, 4, 16>}, {transform_indices = @transform_1, window_bounds = array<i64: 1, 4, 1>}, {transform_indices = @transform_2, window_bounds = array<i64: 1, 4, 1>}]} {
    %c0 = arith.constant 0 : index
    %c0_0 = arith.constant 0 : index
    %c0_1 = arith.constant 0 : index
    %0 = vector.load %arg1[%c0, %c0_0, %c0_1] : memref<1x4x16xf32, #tpu.memory_space<vmem>>, vector<1x4x16xf32>
    %1 = vector.shape_cast %0 : vector<1x4x16xf32> to vector<4x16xf32>
    %cst = arith.constant dense<0.000000e+00> : vector<4xf32>
    %2 = vector.multi_reduction <add>, %1, %cst [1] : vector<4x16xf32> to vector<4xf32>
    %3 = vector.shape_cast %2 : vector<4xf32> to vector<4x1xf32>
    %cst_2 = arith.constant 1.600000e+01 : f32
    %4 = vector.broadcast %cst_2 : f32 to vector<4x1xf32>
    %5 = arith.divf %3, %4 : vector<4x1xf32>
    %6 = vector.broadcast %5 : vector<4x1xf32> to vector<4x16xf32>
    %7 = arith.subf %1, %6 : vector<4x16xf32>
    %8 = arith.mulf %7, %7 : vector<4x16xf32>
    %cst_3 = arith.constant dense<0.000000e+00> : vector<4xf32>
    %9 = vector.multi_reduction <add>, %8, %cst_3 [1] : vector<4x16xf32> to vector<4xf32>
    %10 = vector.shape_cast %9 : vector<4xf32> to vector<4x1xf32>
    %cst_4 = arith.constant 1.600000e+01 : f32
    %11 = vector.broadcast %cst_4 : f32 to vector<4x1xf32>
    %12 = arith.divf %10, %11 : vector<4x1xf32>
    %c0_5 = arith.constant 0 : index
    %c0_6 = arith.constant 0 : index
    %c0_7 = arith.constant 0 : index
    %13 = vector.load %arg2[%c0_5, %c0_6, %c0_7] : memref<1x4x1xf32, #tpu.memory_space<vmem>>, vector<1x4x1xf32>
    %14 = vector.shape_cast %13 : vector<1x4x1xf32> to vector<4x1xf32>
    %15 = vector.shape_cast %5 : vector<4x1xf32> to vector<1x4x1xf32>
    tpu.vector_store %arg2[%c0_5, %c0_6, %c0_7], %15 {strides = array<i32>} : memref<1x4x1xf32, #tpu.memory_space<vmem>>, vector<1x4x1xf32>,
    %c0_8 = arith.constant 0 : index
    %c0_9 = arith.constant 0 : index
    %c0_10 = arith.constant 0 : index
    %16 = vector.load %arg3[%c0_8, %c0_9, %c0_10] : memref<1x4x1xf32, #tpu.memory_space<vmem>>, vector<1x4x1xf32>
    %17 = vector.shape_cast %16 : vector<1x4x1xf32> to vector<4x1xf32>
    %18 = vector.shape_cast %12 : vector<4x1xf32> to vector<1x4x1xf32>
    tpu.vector_store %arg3[%c0_8, %c0_9, %c0_10], %18 {strides = array<i32>} : memref<1x4x1xf32, #tpu.memory_space<vmem>>, vector<1x4x1xf32>,
    return
  }
  func.func @transform_0(%arg0: i32) -> (i32, i32, i32) {
    %c0_i32 = arith.constant 0 : i32
    %c0_i32_0 = arith.constant 0 : i32
    %c0_i32_1 = arith.constant 0 : i32
    return %arg0, %c0_i32, %c0_i32_0 : i32, i32, i32
  }
  func.func @transform_1(%arg0: i32) -> (i32, i32, i32) {
    %c0_i32 = arith.constant 0 : i32
    %c0_i32_0 = arith.constant 0 : i32
    %c0_i32_1 = arith.constant 0 : i32
    return %arg0, %c0_i32, %c0_i32_0 : i32, i32, i32
  }
  func.func @transform_2(%arg0: i32) -> (i32, i32, i32) {
    %c0_i32 = arith.constant 0 : i32
    %c0_i32_0 = arith.constant 0 : i32
    %c0_i32_1 = arith.constant 0 : i32
    return %arg0, %c0_i32, %c0_i32_0 : i32, i32, i32
  }
}

module attributes {stable_mosaic.version = 11 : i64} {
  func.func @_diff_pool_main_kernel(%arg0: i32, %arg1: memref<1x4x16xf32, #tpu.memory_space<vmem>>, %arg2: memref<8x4xf32, #tpu.memory_space<vmem>>, %arg3: memref<1x4x1xf32, #tpu.memory_space<vmem>>, %arg4: memref<1x4x1xf32, #tpu.memory_space<vmem>>, %arg5: memref<1x4x8xf32, #tpu.memory_space<vmem>>) attributes {dimension_semantics = [#tpu.dimension_semantics<parallel>], iteration_bounds = array<i64: 2>, scalar_prefetch = 0 : i64, scratch_operands = 0 : i64, tpu.core_type = #tpu.core_type<tc>, window_params = [{transform_indices = @transform_0, window_bounds = array<i64: 1, 4, 16>}, {pipeline_mode = #tpu.pipeline_mode<synchronous>, transform_indices = @transform_1, window_bounds = array<i64: 8, 4>}, {transform_indices = @transform_2, window_bounds = array<i64: 1, 4, 1>}, {transform_indices = @transform_3, window_bounds = array<i64: 1, 4, 1>}, {transform_indices = @transform_4, window_bounds = array<i64: 1, 4, 8>}]} {
    %c0 = arith.constant 0 : index
    %c0_0 = arith.constant 0 : index
    %c0_1 = arith.constant 0 : index
    %0 = vector.load %arg1[%c0, %c0_0, %c0_1] : memref<1x4x16xf32, #tpu.memory_space<vmem>>, vector<1x4x16xf32>
    %1 = vector.shape_cast %0 : vector<1x4x16xf32> to vector<4x16xf32>
    %c0_2 = arith.constant 0 : index
    %c0_3 = arith.constant 0 : index
    %c0_4 = arith.constant 0 : index
    %2 = vector.load %arg3[%c0_2, %c0_3, %c0_4] : memref<1x4x1xf32, #tpu.memory_space<vmem>>, vector<1x4x1xf32>
    %3 = vector.shape_cast %2 : vector<1x4x1xf32> to vector<4x1xf32>
    %4 = vector.broadcast %3 : vector<4x1xf32> to vector<4x16xf32>
    %5 = arith.mulf %1, %4 : vector<4x16xf32>
    %c0_5 = arith.constant 0 : index
    %c0_6 = arith.constant 0 : index
    %c0_7 = arith.constant 0 : index
    %6 = vector.load %arg4[%c0_5, %c0_6, %c0_7] : memref<1x4x1xf32, #tpu.memory_space<vmem>>, vector<1x4x1xf32>
    %7 = vector.shape_cast %6 : vector<1x4x1xf32> to vector<4x1xf32>
    %8 = vector.broadcast %7 : vector<4x1xf32> to vector<4x16xf32>
    %9 = arith.addf %5, %8 : vector<4x16xf32>
    %cst = arith.constant 0.000000e+00 : f32
    %10 = vector.broadcast %cst : f32 to vector<4x16xf32>
    %11 = arith.maximumf %9, %10 : vector<4x16xf32>
    %c0_8 = arith.constant 0 : index
    %c0_9 = arith.constant 0 : index
    %12 = vector.load %arg2[%c0_8, %c0_9] : memref<8x4xf32, #tpu.memory_space<vmem>>, vector<8x4xf32>
    %cst_10 = arith.constant dense<0.000000e+00> : vector<8x16xf32>
    %13 = tpu.matmul %12, %11, %cst_10 {dimension_numbers = #tpu.dot_dimension_numbers<[1], [0], [0], [1], [0, 0, 1, 1], [], []>} : vector<8x4xf32>, vector<4x16xf32>, vector<8x16xf32> -> vector<8x16xf32>
    %cst_11 = arith.constant dense<0xFF800000> : vector<8xf32>
    %14 = vector.multi_reduction <maximumf>, %13, %cst_11 [1] : vector<8x16xf32> to vector<8xf32>
    %15 = vector.shape_cast %14 : vector<8xf32> to vector<8x1xf32>
    %16 = vector.broadcast %15 : vector<8x1xf32> to vector<8x16xf32>
    %17 = arith.subf %13, %16 : vector<8x16xf32>
    %18 = math.exp %17 : vector<8x16xf32>
    %cst_12 = arith.constant dense<0.000000e+00> : vector<8xf32>
    %19 = vector.multi_reduction <add>, %18, %cst_12 [1] : vector<8x16xf32> to vector<8xf32>
    %20 = vector.shape_cast %19 : vector<8xf32> to vector<8x1xf32>
    %21 = tpu.reciprocal %20 {approx = true} : vector<8x1xf32> -> vector<8x1xf32>
    %22 = vector.broadcast %21 : vector<8x1xf32> to vector<8x16xf32>
    %23 = arith.mulf %18, %22 : vector<8x16xf32>
    %cst_13 = arith.constant dense<0.000000e+00> : vector<4x8xf32>
    %24 = tpu.matmul %1, %23, %cst_13 {dimension_numbers = #tpu.dot_dimension_numbers<[1], [1], [0], [0], [0, 0, 1, 0], [], []>} : vector<4x16xf32>, vector<8x16xf32>, vector<4x8xf32> -> vector<4x8xf32>
    %c0_14 = arith.constant 0 : index
    %c0_15 = arith.constant 0 : index
    %c0_16 = arith.constant 0 : index
    %25 = vector.load %arg5[%c0_14, %c0_15, %c0_16] : memref<1x4x8xf32, #tpu.memory_space<vmem>>, vector<1x4x8xf32>
    %26 = vector.shape_cast %25 : vector<1x4x8xf32> to vector<4x8xf32>
    %27 = vector.shape_cast %24 : vector<4x8xf32> to vector<1x4x8xf32>
    tpu.vector_store %arg5[%c0_14, %c0_15, %c0_16], %27 {strides = array<i32>} : memref<1x4x8xf32, #tpu.memory_space<vmem>>, vector<1x4x8xf32>,
    return
  }
  func.func @transform_0(%arg0: i32) -> (i32, i32, i32) {
    %c0_i32 = arith.constant 0 : i32
    %c0_i32_0 = arith.constant 0 : i32
    %c0_i32_1 = arith.constant 0 : i32
    return %arg0, %c0_i32, %c0_i32_0 : i32, i32, i32
  }
  func.func @transform_1(%arg0: i32) -> (i32, i32) {
    %c0_i32 = arith.constant 0 : i32
    %c0_i32_0 = arith.constant 0 : i32
    %c0_i32_1 = arith.constant 0 : i32
    return %c0_i32, %c0_i32_0 : i32, i32
  }
  func.func @transform_2(%arg0: i32) -> (i32, i32, i32) {
    %c0_i32 = arith.constant 0 : i32
    %c0_i32_0 = arith.constant 0 : i32
    %c0_i32_1 = arith.constant 0 : i32
    return %arg0, %c0_i32, %c0_i32_0 : i32, i32, i32
  }
  func.func @transform_3(%arg0: i32) -> (i32, i32, i32) {
    %c0_i32 = arith.constant 0 : i32
    %c0_i32_0 = arith.constant 0 : i32
    %c0_i32_1 = arith.constant 0 : i32
    return %arg0, %c0_i32, %c0_i32_0 : i32, i32, i32
  }
  func.func @transform_4(%arg0: i32) -> (i32, i32, i32) {
    %c0_i32 = arith.constant 0 : i32
    %c0_i32_0 = arith.constant 0 : i32
    %c0_i32_1 = arith.constant 0 : i32
    return %arg0, %c0_i32, %c0_i32_0 : i32, i32, i32
  }
}

</mosaic_0001>

<bundles_post_ra>
// kernel: diff_pool_forward.2
= control target key start
LH: loop header
LB: loop body
LE: loop exit
PB: predicated region body
PF: predicated region fallthrough
CT: control target
= control target key end

     0   :  { %8 = vsyncpa [#allocation3], 0  ;;  %s524_s0 = inlined_call_operand.hbm [shape: f32[2,4,16], index: 0, kind: input, shape index: {}]   ;;  %s525_s1 = inlined_call_operand.vmem [shape: f32[2,4,1], index: 1, kind: output, shape index: {0}]   ;;  %s526_s2 = inlined_call_operand.vmem [shape: f32[2,4,1], index: 2, kind: output, shape index: {1}]  }
   0x1   :  { %10 = vsyncpa [#allocation3 + $0x1], 0  ;;  %s425_s9 = smov 0   ;;  %s427_s10 = smov 0  }
   0x2   :  { %s429_s11 = smov 0   ;;  %s431_s12 = smov 0  }
   0x3 LB: > { %s444_s13 = sadd.s32 4294967295, %s407_s12   ;;  %s447_s14 = sadd.s32 1, %s407_s12   ;;  %s407_s12 = sphi %s431_s12, %s533_s12   ;;  %s403_s11 = sphi %s429_s11, %s532_s11   ;;  %s399_s10 = sphi %s427_s10, %s531_s10   ;;  %s395_s9 = sphi %s425_s9, %s530_s9  }
   0x4   : > { %s20_s15 = ssub.s32 %s407_s12, %s447_s14  ;;  %s23_s16 = sadd.s32 1, %s403_s11 }
   0x5   : > { %p21_p0 = scmp.eq.s32.totalorder %s20_s15, 0  ;;  %p30_p1 = scmp.ne.s32.totalorder %s403_s11, %s399_s10 }
   0x6   : > { %p31_p2 = scmp.eq.s32.totalorder %s407_s12, 0  ;;  %p36_p3 = scmp.ne.s32.totalorder %s399_s10, %s395_s9 }
   0x7   : > { %s457_s17 = scalar_select %p21_p0, %s403_s11, %s23_s16  }
   0x8   : > { %p459_p4 = por %p31_p2, %p30_p1  ;;  %p37_p5 = scmp.eq.s32.totalorder %s444_s13, 0 }
   0x9   : > { %p307_p6 = scmp.lt.s32.totalorder %s407_s12, 2  ;;  %s112_s20 = sand.u32 1, %s403_s11  }
   0xa   : > { %p465_p7 = por %p37_p5, %p36_p3  ;;  %s293_s21 = sshll.u32 %s112_s20, 2 }
   0xb   : > { %s294_s22 = sshll.u32 %s407_s12, 2  ;;  %s116_s26 = scalar_lea.vmem [#allocation2], %s293_s21 }
   0xc   : > { %s120_s25 = scalar_lea.hbm %s524_s0, %s294_s22  ;;  %s124_s27 = sshll.u32 %s116_s26, 4  ;;  %s125_s27 = int_to_ptr.vmem [resolvable:$true] %s124_s27 }
   0xd   : > { %s122_s28 = sshll.u32 %s120_s25, 4  ;;  %p476_p8 = pnand %p307_p6, %p459_p4  ;;  %s123_s28 = int_to_ptr.hbm [resolvable:$true] %s122_s28 }
   0xe   : > { %p295_p9 = scmp.ge.s32.totalorder %s407_s12, 1  ;;  %p129_p10 = scmp.lt.s32.totalorder %s407_s12, 3 }
   0xf   : > { %s113_s30 = scalar_lea.sflag [#allocation3], %s112_s20  ;;  %s343_s3 = sshra.s32 %s123_s28, 4  ;;  %s344_s3 = int_to_ptr.hbm [resolvable:$true] %s343_s3 }
  0x10   : > { %s345_s4 = scalar_lea.hbm %s344_s3, 4  ;;  %p347_p12 = pneg %p476_p8 }
  0x11   : > { %p346_p11 = scmp.ne.s32.totalorder %s344_s3, %s345_s4  ;;  %s350_s7 = scalar_lea.hbm %s524_s0, 8 }
  0x12   : > { %p351_p1 = scmp.lt.s32.totalorder %s344_s3, %s524_s0  ;;  %p352_p2 = scmp.lt.s32.totalorder %s350_s7, %s345_s4 }
  0x13   : > { %p348_p13 = pnand %p347_p12, %p346_p11 }
  0x14   : > { %p353_p3 = por %p352_p2, %p351_p1 }
  0x15   : > { %p349_p0 = pneg %p348_p13 }
  0x17   : > { %p354_p4 = pnand %p353_p3, %p349_p0 }
  0x19   : > { %357 = shalt.err (!%p354_p4)
}
  0x1a   : > { %306 = dma.hbm_to_vmem [thread:$0]  (!%p476_p8), %s123_s28, 64, %s125_s27, %s113_s30  }
  0x1b   : > { %p130_p5 = pnand %p295_p9, %p129_p10 }
  0x1c   : > { %s135_s15 = sand.u32 (!%p130_p5), 1, %s399_s10  }
  0x1d   : > { %133 = sbr.rel (%p130_p5) target bundleno = 279 (0x117), region = 24  ;;  %s296_s16 = sshll.u32 (!%p130_p5), %s135_s15, 2 }
  0x1e   : > { %s136_s18 = scalar_lea.sflag (!%p130_p5), [#allocation3], %s135_s15  ;;  %s139_s20 = scalar_lea.vmem (!%p130_p5), [#allocation2], %s296_s16 }
  0x22   : > { %390 = dma.done.wait (%p465_p7), %s136_s18, 64  }
  0x23   : > { %392 = vsyncadd (%p465_p7), %s136_s18, 4294967232  ;;  %vm173_vm0 = vcmask 125952   ;;  %v172_v0 = vld [vmem:[%s139_s20] sm:$0xf]  ;;  %v409_v2 = vmov 16.0   ;;  %p164_p6 = scmp.lt.s32.totalorder %s444_s13, 1 }
  0x24   : > { %v174_v1 = vsel %vm173_vm0, %v172_v0, 0.0  ;;  %341 = vrcp.f32 %v409_v2  ;;  %vm191_vm2 = vcmask 3072  }
  0x25   : > { %175 = vadd.xlane.f32.xlu0 %v174_v1  ;;  %s535_s13 = smov (!%p164_p6, %s444_s13), 1 }
  0x26   : > { %s297_s12 = sshll.u32 %s535_s13, 2 }
  0x27   : > { %s167_s22 = scalar_lea.vmem %s525_s1, %s297_s12  ;;  %s171_s25 = scalar_lea.vmem %s526_s2, %s297_s12 }
  0x2a   : > { %v342_v3 = vpop.eup %341 }
  0x2b   : > { %v178_v4 = vmul.f32 16.0, %v342_v3  ;;  %vm182_vm1 = vweird.f32 %v342_v3 }
  0x2d   : > { %v179_v5 = vsub.f32 1.0, %v178_v4 }
  0x2f   : > { %v180_v6 = vmul.f32 %v342_v3, %v179_v5 }
  0x31   : > { %v181_v7 = vadd.f32 %v342_v3, %v180_v6 }
  0x33   : > { %v183_v8 = vsel %vm182_vm1, %v342_v3, %v181_v7 }
  0x98   : > { %v176_v9 = vpop.xlane.xlu0 %175 }
  0x99   : > { %v184_v10 = vmul.f32 %v183_v8, %v176_v9 }
  0x9b   : > { %v185_v11 = vsub.f32 %v172_v0, %v184_v10  ;;  %192 = vst.msk [vmem:[%s167_s22] sm:$0xf] %vm191_vm2, %v184_v10 }
  0x9d   : > { %v186_v12 = vmul.f32 %v185_v11, %v185_v11 }
  0x9f   : > { %v187_v13 = vsel %vm173_vm0, %v186_v12, 0.0 }
  0xa0   : > { %188 = vadd.xlane.f32.xlu0 %v187_v13 }
 0x113   : > { %v189_v14 = vpop.xlane.xlu0 %188 }
 0x114   : > { %v190_v15 = vmul.f32 %v189_v14, %v183_v8 }
 0x116   : > { %193 = vst.msk [vmem:[%s171_s25] sm:$0xf] %vm191_vm2, %v190_v15 }
 0x117 PF: > { %p13_p7 = scmp.ge.s32.totalorder %s447_s14, 4   ;;  %s530_s9 = smov %s399_s10 }
 0x118   : > { %s531_s10 = smov %s403_s11  ;;  %s532_s11 = smov %s457_s17 }
 0x119   : > { %s533_s12 = smov %s447_s14  ;;  %15 = sbr.rel (!%p13_p7) target bundleno = 3 (0x3), region = 76 }
 0x11e   :  { %227 = vsyncpa [#allocation3], 1 }
 0x11f   :  { %229 = vsyncpa [#allocation3 + $0x1], 1 }

// kernel: diff_pool_forward.3
= control target key start
LH: loop header
LB: loop body
LE: loop exit
PB: predicated region body
PF: predicated region fallthrough
CT: control target
= control target key end

     0   :  { %9 = vsyncpa [#allocation3], 0  ;;  %s660_s0 = inlined_call_operand.vmem [shape: f32[2,4,16], index: 0, kind: input, shape index: {}]   ;;  %s661_s1 = inlined_call_operand.vmem [shape: f32[8,4], index: 1, kind: input, shape index: {}]   ;;  %s662_s2 = inlined_call_operand.vmem [shape: f32[2,4,1], index: 2, kind: input, shape index: {}]   ;;  %s663_s3 = inlined_call_operand.vmem [shape: f32[2,4,1], index: 3, kind: input, shape index: {}]   ;;  %s664_s4 = inlined_call_operand.hbm [shape: f32[2,4,8], index: 4, kind: output, shape index: {}]  }
   0x1   :  { %11 = vsyncpa [#allocation3 + $0x1], 0  ;;  %s562_s15 = smov 0   ;;  %s564_s16 = smov 0  }
   0x2   :  { %s566_s17 = smov 0   ;;  %s568_s18 = smov 0  }
   0x3 LB: > { %s583_s19 = sadd.s32 4294967295, %s534_s18   ;;  %s411_s20 = sadd.s32 4294967294, %s534_s18   ;;  %s534_s18 = sphi %s568_s18, %s670_s18   ;;  %s530_s17 = sphi %s566_s17, %s669_s17   ;;  %s526_s16 = sphi %s564_s16, %s668_s16   ;;  %s522_s15 = sphi %s562_s15, %s667_s15  }
   0x4   : > { %s587_s21 = sadd.s32 1, %s534_s18   ;;  %s123_s22 = sadd.s32 1, %s530_s17 }
   0x5   : > { %s120_s23 = ssub.s32 %s534_s18, %s587_s21  ;;  %p133_p0 = scmp.ne.s32.totalorder %s530_s17, %s526_s16 }
   0x6   : > { %p121_p1 = scmp.eq.s32.totalorder %s120_s23, 0  ;;  %p134_p2 = scmp.eq.s32.totalorder %s583_s19, 1 }
   0x7   : > { %p139_p3 = scmp.ne.s32.totalorder %s526_s16, %s522_s15  ;;  %p140_p4 = scmp.eq.s32.totalorder %s411_s20, 1 }
   0x8   : > { %s598_s24 = scalar_select %p121_p1, %s530_s17, %s123_s22  }
   0x9   : > { %p600_p5 = por %p134_p2, %p133_p0  ;;  %p604_p6 = por %p140_p4, %p139_p3 }
   0xa   : > { %p414_p7 = scmp.ge.s32.totalorder %s534_s18, 1  ;;  %p182_p8 = scmp.lt.s32.totalorder %s534_s18, 3 }
   0xc   : > { %p183_p9 = pnand %p414_p7, %p182_p8 }
   0xd   : > { %p215_p10 = scmp.lt.s32.totalorder (!%p183_p9), %s583_s19, 1  ;;  %s212_s14 = sand.u32 (!%p183_p9), 1, %s526_s16  }
   0xe   : > { %186 = sbr.rel (%p183_p9) target bundleno = 664 (0x298), region = 36  ;;  %s415_s20 = sshll.u32 (!%p183_p9), %s212_s14, 2 }
   0xf   : > { %s424_s22 = sshll.u32 (!%p183_p9), %s583_s19, 2  ;;  %s214_s29 = scalar_lea.vmem (!%p183_p9), [#allocation2], %s415_s20 }
  0x10   : > { %s325_s30 = sshll.u32 (!%p183_p9), %s214_s29, 4  ;;  %s313_s6 = scalar_lea.sflag (!%p183_p9), [#allocation3], %s212_s14  ;;  %s326_s30 = int_to_ptr.vmem [resolvable:$true] %s325_s30 }
  0x11   : > { %s492_s10 = scalar_lea.hbm (!%p183_p9), %s664_s4, 8 }
  0x13   : > { %v536_v0 = vmov 0   ;;  %s216_s27 = scalar_select %p215_p10, %s583_s19, 1  ;;  %vm248_vm0 = vcmask 1043456   ;;  %v243_v9 = vld [vmem:[%s661_s1] sm:$0xff]  ;;  %vm244_vm1 = vcmask 31744   ;;  %vm272_vm2 = vcmask 130048  }
  0x14   : > { %467 = vset.pattern.permute.xlu0 %v536_v0  ;;  %vm310_vm3 = vcmask 60416  }
  0x15   : > { %s416_s28 = sshll.u32 %s216_s27, 2 }
  0x16   : > { %s222_s5 = scalar_lea.vmem %s662_s2, %s416_s28  ;;  %s226_s8 = scalar_lea.vmem %s663_s3, %s416_s28 }
  0x17   : > { %v228_v1 = vld [vmem:[%s222_s5] sm:$0xf]  ;;  %s218_s11 = scalar_lea.vmem %s660_s0, %s416_s28  ;;  %s323_s28 = scalar_lea.hbm %s664_s4, %s424_s22 }
  0x18   : > { %231 = vperm.xlu0 %467, %v228_v1   ;;  %v235_v2 = vld [vmem:[%s226_s8] sm:$0xf]  ;;  %s327_s5 = sshll.u32 %s323_s28, 4  ;;  %s328_s5 = int_to_ptr.hbm [resolvable:$true] %s327_s5 }
  0x19   : > { %v227_v4 = vld [vmem:[%s218_s11] sm:$0xf]  ;;  %s486_s7 = sshra.s32 %s328_s5, 4  ;;  %s487_s7 = int_to_ptr.hbm [resolvable:$true] %s486_s7 }
  0x1a   : > { %s488_s8 = scalar_lea.hbm %s487_s7, 4  ;;  %p493_p0 = scmp.lt.s32.totalorder %s487_s7, %s664_s4 }
  0x1b   : > { %p489_p11 = scmp.ne.s32.totalorder %s487_s7, %s488_s8  ;;  %p494_p1 = scmp.lt.s32.totalorder %s492_s10, %s488_s8 }
  0x1d   : > { %p490_p12 = pnand %p489_p11, %p600_p5  ;;  %p495_p2 = por %p494_p1, %p493_p0 }
  0x1f   : > { %p491_p13 = pneg %p490_p12 }
  0x20   : > { %238 = vperm.xlu0 %467, %v235_v2  }
  0x21   : > { %p496_p3 = pnand %p495_p2, %p491_p13 }
  0x8a   : > { %v232_v3 = vpop.permute.xlu0 %231 }
  0x8b   : > { %v234_v5 = vmul.f32 %v232_v3, %v227_v4 }
  0x92   : > { %v239_v6 = vpop.permute.xlu0 %238 }
  0x93   : > { %v241_v7 = vadd.f32 %v239_v6, %v234_v5 }
  0x95   : > { %v242_v8 = vmax.f32 %v241_v7, 0.0 }
  0x97   : > { %419 = vmatpush.msk.msra.mxu0 %vm248_vm0, %v242_v8 }
  0x98   : > { %420 = vmatmul.msk.f32.vlgmr.msra.gmra.mxu0 %vm244_vm1, %v243_v9 }
 0x115   : > { %v269_v10 = vpop.f32.mrf.mxu0 }
 0x116   : > { %v273_v11 = vsel %vm272_vm2, %v269_v10, -inf }
 0x117   : > { %274 = vmax.xlane.f32.xlu1 %v273_v11 }
 0x18a   : > { %v275_v12 = vpop.xlane.xlu1 %274 }
 0x18b   : > { %v276_v13 = vsub.f32 %v269_v10, %v275_v12 }
 0x18d   : > { %v277_v14 = vmul.f32 1.442695, %v276_v13 }
 0x18f   : > { %468 = vpow2.f32 %v277_v14 }
 0x195   : > { %v469_v15 = vpop.eup %468 }
 0x196   : > { %v279_v16 = vsel %vm272_vm2, %v469_v15, 0.0 }
 0x197   : > { %280 = vadd.xlane.f32.xlu1 %v279_v16 }
 0x20a   : > { %v281_v17 = vpop.xlane.xlu1 %280 }
 0x20b   : > { %470 = vrcp.f32 %v281_v17 }
 0x211   : > { %v471_v18 = vpop.eup %470 }
 0x212   : > { %v283_v19 = vmul.f32 %v471_v18, %v469_v15 }
 0x214   : > { %421 = vmatpush.xpose.msk.msra.mxu1 %vm272_vm2, %v283_v19 }
 0x217   : > { %422 = vmatmul.msk.f32.vlgmr.msra.gmra.mxu1 %vm272_vm2, %v227_v4 }
 0x294   : > { %v307_v20 = vpop.f32.mrf.mxu1 }
 0x295   : > { %311 = vst.msk [vmem:[%s214_s29] sm:$0xf] %vm310_vm3, %v307_v20 }
 0x296   : > { %499 = shalt.err (!%p496_p3)
}
 0x297   : > { %427 = dma.vmem_to_hbm [thread:$0]  (%p600_p5), %s326_s30, 64, %s328_s5, %s313_s6  }
 0x298 PF: > { %p433_p4 = scmp.ge.s32.totalorder %s534_s18, 2  ;;  %s339_s13 = sand.u32 1, %s522_s15  }
 0x299   : > { %s340_s14 = scalar_lea.sflag [#allocation3], %s339_s13 }
 0x29a   : > { %p430_p7 = pnand %p433_p4, %p604_p6 }
 0x29c   : > { %p431_p8 = pneg %p430_p7 }
 0x29e   : > { %517 = dma.done.wait (%p431_p8), %s340_s14, 64  }
 0x29f   : > { %519 = vsyncadd (%p431_p8), %s340_s14, 4294967232  ;;  %p14_p9 = scmp.ge.s32.totalorder %s587_s21, 4   ;;  %s667_s15 = smov %s526_s16 }
 0x2a0   : > { %s668_s16 = smov %s530_s17  ;;  %s669_s17 = smov %s598_s24 }
 0x2a1   : > { %s670_s18 = smov %s587_s21  ;;  %16 = sbr.rel (!%p14_p9) target bundleno = 3 (0x3), region = 77 }
 0x2a6   :  { %346 = vsyncpa [#allocation3], 1 }
 0x2a7   :  { %348 = vsyncpa [#allocation3 + $0x1], 1 }

</bundles_post_ra>
